<compile_context>
chip_gen: v5e
topology: v5e:2x2
jax: 0.10.0
libtpu: 0.0.40
codegen_flags: <defaults>
</compile_context>

<pallas_src>
import functools

import jax
import jax.numpy as jnp
from jax.experimental import pallas as pl
from jax.experimental.pallas import tpu as pltpu


_LANE_CHUNK = 2048       # in-kernel compute chunk: temporaries stay ~64 KiB
_VMEM_BUDGET = 8 << 20   # double-buffered pipeline-block budget; comfortably
                         # under v5e's 16 MiB default scoped-VMEM limit


def _round_up(x, m):
    return (x + m - 1) // m * m


def _prefer_mxu():
    """v7x-class chips: HBM (~3.2 TB/s) is fast enough that the VPU MAC chain
    becomes the binding slot, so route the channel mix through the otherwise
    idle MXU there. On v5e/v6e the VPU path sits under HBM slack (free)."""
    try:
        kind = jax.devices()[0].device_kind.lower()
    except Exception:
        return False
    return any(tok in kind for tok in ("v7", "tpu7", "7x"))


def _output_block_kernel(x_ref, w_ref, b_ref, a_ref, o_ref, *, use_dot):
    # x_ref: (NB, C_in, T)  input dtype, lane-dense spatial tile
    # w_ref: (C_out, C_in)  f32, grid-resident
    # b_ref: (C_out, 1)     f32, grid-resident
    # a_ref: (1,)           f32 in SMEM (PReLU shared alpha)
    # o_ref: (NB, C_out, T) input dtype
    nb, c_in, t_blk = x_ref.shape

    w = w_ref[...]
    b = b_ref[...]
    alpha = a_ref[0]

    # Hoist the per-channel weight-column splats once per grid step
    # (JAX does not CSE broadcast_in_dim across the unrolled loops below).
    w_cols = None if use_dot else [w[:, c:c + 1] for c in range(c_in)]

    # Chunk the lane axis so elementwise temporaries stay register/VMEM-tiny
    # even when the DMA block (T) is very large.
    chunk = min(_LANE_CHUNK, t_blk)
    for n in range(nb):                       # static unroll over folded batches
        for s0 in range(0, t_blk, chunk):     # static unroll over lane chunks
            cs = min(chunk, t_blk - s0)
            xb = x_ref[n, :, s0:s0 + cs].astype(jnp.float32)    # (C_in, cs)
            if use_dot:
                # MXU path (v7x or wide channel counts).
                y = jnp.dot(w, xb, preferred_element_type=jnp.float32)
            else:
                # Tiny contraction as C_in broadcast multiply-adds on the VPU.
                y = w_cols[0] * xb[0:1, :]
                for c in range(1, c_in):
                    y = y + w_cols[c] * xb[c:c + 1, :]
            y = y + b                                           # (C_out, cs)
            y = jnp.where(y > 0.0, y, alpha * y)                # PReLU
            o_ref[n, :, s0:s0 + cs] = y.astype(o_ref.dtype)


@functools.partial(jax.jit, static_argnames=("max_tile",))
def output_block_forward(x_nchw, weight, bias, alpha, *, max_tile=32768):
    """Conv2d(kernel_size=1) + PReLU (single shared alpha), NCHW layout.

    x_nchw: (N, C_in, H, W); weight: (C_out, C_in) or (C_out, C_in, 1, 1);
    bias: (C_out,); alpha: scalar.
    """
    assert max_tile % 128 == 0
    N, C_in, H, W = x_nchw.shape
    weight = jnp.asarray(weight, jnp.float32).reshape(weight.shape[0], -1)
    C_out = weight.shape[0]
    HW = H * W

    # NCHW -> (N, C_in, H*W): free reshape, native dtype (no wrapper astype —
    # bf16 inputs are DMA'd as bf16 and cast to f32 inside the kernel).
    x = x_nchw.reshape(N, C_in, HW)

    # Spatial tile: full extent when it fits, else a large multiple of 128.
    # Ragged tails are handled by the cdiv grid (no wrapper pad / slice).
    T = HW if HW <= max_tile else max_tile

    # Fold batches into the leading block dim under a conservative
    # double-buffered VMEM budget (amortizes per-grid-step overhead).
    rows_pad = _round_up(C_in, 8) + _round_up(C_out, 8)
    per_batch = 2 * rows_pad * T * 4
    NB = int(min(N, max(1, _VMEM_BUDGET // per_batch)))

    g_b = -(-N // NB)
    g_s = -(-HW // T)
    # Keep >= 2 grid steps so the v7x megacore can shard across both TCs.
    if g_b * g_s == 1:
        if N >= 2:
            NB = (N + 1) // 2
            g_b = -(-N // NB)
        elif HW >= 256:
            T = _round_up(-(-HW // 2), 128)
            g_s = -(-HW // T)

    b_mat = jnp.asarray(bias, jnp.float32).reshape(C_out, 1)
    a_vec = jnp.asarray(alpha, jnp.float32).reshape(1)

    kern = functools.partial(_output_block_kernel,
                             use_dot=(_prefer_mxu() or C_in > 16))

    out = pl.pallas_call(
        kern,
        out_shape=jax.ShapeDtypeStruct((N, C_out, HW), x.dtype),
        grid_spec=pltpu.PrefetchScalarGridSpec(
            num_scalar_prefetch=0,
            grid=(g_b, g_s),
            in_specs=[
                # x: batches folded in the leading (unconstrained) block dim,
                # channels on sublanes, spatial lane-dense.
                pl.BlockSpec((NB, C_in, T), lambda b, s: (b, 0, s)),
                # weight / bias: tiny, same block every step (grid-resident).
                pl.BlockSpec((C_out, C_in), lambda b, s: (0, 0)),
                pl.BlockSpec((C_out, 1), lambda b, s: (0, 0)),
                # alpha: scalar in SMEM, no VMEM tile / vector load path.
                pl.BlockSpec(memory_space=pltpu.MemorySpace.SMEM),
            ],
            out_specs=pl.BlockSpec((NB, C_out, T), lambda b, s: (b, 0, s)),
        ),
        compiler_params=pltpu.CompilerParams(
            dimension_semantics=("parallel", "parallel")),
    )(x, weight, b_mat, a_vec)

    return out.reshape(N, C_out, H, W)


def _reference(x_nchw, weight, bias, alpha):
    # Pure-JAX reference of Conv2d(1x1) + PReLU for validation.
    y = jnp.einsum("nchw,oc->nohw", x_nchw.astype(jnp.float32),
                   weight.astype(jnp.float32))
    y = y + bias[None, :, None, None]
    return jnp.where(y > 0, y, alpha * y).astype(x_nchw.dtype)


if __name__ == "__main__":
    key = jax.random.PRNGKey(0)
    k_x, k_w, k_b, k_x2 = jax.random.split(key, 4)

    # num_channels = (C_in, C_out) = (4, 8); small NCHW input.
    N, C_in, C_out, H, W = 2, 4, 8, 16, 16
    x = jax.random.normal(k_x, (N, C_in, H, W), jnp.float32)

    # Parameter shapes per nn.Conv2d(4, 8, kernel_size=1) and nn.PReLU()
    # (default single shared alpha = 0.25).
    weight = jax.random.normal(k_w, (C_out, C_in), jnp.float32) * 0.1
    bias = jax.random.normal(k_b, (C_out,), jnp.float32) * 0.1
    alpha = jnp.float32(0.25)

    out = output_block_forward(x, weight, bias, alpha)
    out = jax.block_until_ready(out)
    ref = _reference(x, weight, bias, alpha)
    assert out.shape == (N, C_out, H, W)
    assert jnp.allclose(out, ref, atol=1e-5, rtol=1e-5)

    # Second check: non-divisible spatial extent exercises the cdiv grid's
    # ragged last tile (no wrapper-side pad/slice).
    x2 = jax.random.normal(k_x2, (1, C_in, 24, 20), jnp.float32)
    out2 = jax.block_until_ready(
        output_block_forward(x2, weight, bias, alpha, max_tile=256))
    ref2 = _reference(x2, weight, bias, alpha)
    assert jnp.allclose(out2, ref2, atol=1e-5, rtol=1e-5)

    print("KERNEL_OK")
</pallas_src>

<mosaic_0001>
module attributes {stable_mosaic.version = 11 : i64} {
  func.func @_output_block_kernel(%arg0: i32, %arg1: i32, %arg2: memref<1x4x256xf32, #tpu.memory_space<vmem>>, %arg3: memref<8x4xf32, #tpu.memory_space<vmem>>, %arg4: memref<8x1xf32, #tpu.memory_space<vmem>>, %arg5: memref<1xf32, #tpu.memory_space<smem>>, %arg6: memref<1x8x256xf32, #tpu.memory_space<vmem>>) attributes {dimension_semantics = [#tpu.dimension_semantics<parallel>, #tpu.dimension_semantics<parallel>], iteration_bounds = array<i64: 2, 1>, scalar_prefetch = 0 : i64, scratch_operands = 0 : i64, tpu.core_type = #tpu.core_type<tc>, window_params = [{transform_indices = @transform_0, window_bounds = array<i64: 1, 4, 256>}, {pipeline_mode = #tpu.pipeline_mode<synchronous>, transform_indices = @transform_1, window_bounds = array<i64: 8, 4>}, {pipeline_mode = #tpu.pipeline_mode<synchronous>, transform_indices = @transform_2, window_bounds = array<i64: 8, 1>}, {transform_indices = @transform_3, window_bounds = array<i64: 1>}, {transform_indices = @transform_4, window_bounds = array<i64: 1, 8, 256>}]} {
    %c0 = arith.constant 0 : index
    %c0_0 = arith.constant 0 : index
    %0 = vector.load %arg3[%c0, %c0_0] : memref<8x4xf32, #tpu.memory_space<vmem>>, vector<8x4xf32>
    %c0_1 = arith.constant 0 : index
    %c0_2 = arith.constant 0 : index
    %1 = vector.load %arg4[%c0_1, %c0_2] : memref<8x1xf32, #tpu.memory_space<vmem>>, vector<8x1xf32>
    %c0_3 = arith.constant 0 : index
    %2 = memref.load %arg5[%c0_3] : memref<1xf32, #tpu.memory_space<smem>>
    %3 = vector.extract_strided_slice %0 {offsets = [0, 0], sizes = [8, 1], strides = [1, 1]} : vector<8x4xf32> to vector<8x1xf32>
    %4 = vector.extract_strided_slice %0 {offsets = [0, 1], sizes = [8, 1], strides = [1, 1]} : vector<8x4xf32> to vector<8x1xf32>
    %5 = vector.extract_strided_slice %0 {offsets = [0, 2], sizes = [8, 1], strides = [1, 1]} : vector<8x4xf32> to vector<8x1xf32>
    %6 = vector.extract_strided_slice %0 {offsets = [0, 3], sizes = [8, 1], strides = [1, 1]} : vector<8x4xf32> to vector<8x1xf32>
    %c0_4 = arith.constant 0 : index
    %c0_5 = arith.constant 0 : index
    %c0_6 = arith.constant 0 : index
    %7 = vector.load %arg2[%c0_4, %c0_5, %c0_6] : memref<1x4x256xf32, #tpu.memory_space<vmem>>, vector<1x4x256xf32>
    %8 = vector.shape_cast %7 : vector<1x4x256xf32> to vector<4x256xf32>
    %9 = vector.extract_strided_slice %8 {offsets = [0, 0], sizes = [1, 256], strides = [1, 1]} : vector<4x256xf32> to vector<1x256xf32>
    %10 = vector.broadcast %3 : vector<8x1xf32> to vector<8x256xf32>
    %11 = vector.broadcast %9 : vector<1x256xf32> to vector<8x256xf32>
    %12 = arith.mulf %10, %11 : vector<8x256xf32>
    %13 = vector.extract_strided_slice %8 {offsets = [1, 0], sizes = [1, 256], strides = [1, 1]} : vector<4x256xf32> to vector<1x256xf32>
    %14 = vector.broadcast %4 : vector<8x1xf32> to vector<8x256xf32>
    %15 = vector.broadcast %13 : vector<1x256xf32> to vector<8x256xf32>
    %16 = arith.mulf %14, %15 : vector<8x256xf32>
    %17 = arith.addf %12, %16 : vector<8x256xf32>
    %18 = vector.extract_strided_slice %8 {offsets = [2, 0], sizes = [1, 256], strides = [1, 1]} : vector<4x256xf32> to vector<1x256xf32>
    %19 = vector.broadcast %5 : vector<8x1xf32> to vector<8x256xf32>
    %20 = vector.broadcast %18 : vector<1x256xf32> to vector<8x256xf32>
    %21 = arith.mulf %19, %20 : vector<8x256xf32>
    %22 = arith.addf %17, %21 : vector<8x256xf32>
    %23 = vector.extract_strided_slice %8 {offsets = [3, 0], sizes = [1, 256], strides = [1, 1]} : vector<4x256xf32> to vector<1x256xf32>
    %24 = vector.broadcast %6 : vector<8x1xf32> to vector<8x256xf32>
    %25 = vector.broadcast %23 : vector<1x256xf32> to vector<8x256xf32>
    %26 = arith.mulf %24, %25 : vector<8x256xf32>
    %27 = arith.addf %22, %26 : vector<8x256xf32>
    %28 = vector.broadcast %1 : vector<8x1xf32> to vector<8x256xf32>
    %29 = arith.addf %27, %28 : vector<8x256xf32>
    %cst = arith.constant 0.000000e+00 : f32
    %30 = vector.broadcast %cst : f32 to vector<8x256xf32>
    %31 = arith.cmpf ogt, %29, %30 : vector<8x256xf32>
    %32 = vector.broadcast %2 : f32 to vector<8x256xf32>
    %33 = arith.mulf %32, %29 : vector<8x256xf32>
    %34 = arith.select %31, %29, %33 : vector<8x256xi1>, vector<8x256xf32>
    %c0_7 = arith.constant 0 : index
    %c0_8 = arith.constant 0 : index
    %c0_9 = arith.constant 0 : index
    %35 = vector.load %arg6[%c0_7, %c0_8, %c0_9] : memref<1x8x256xf32, #tpu.memory_space<vmem>>, vector<1x8x256xf32>
    %36 = vector.shape_cast %35 : vector<1x8x256xf32> to vector<8x256xf32>
    %37 = vector.shape_cast %34 : vector<8x256xf32> to vector<1x8x256xf32>
    tpu.vector_store %arg6[%c0_7, %c0_8, %c0_9], %37 {strides = array<i32>} : memref<1x8x256xf32, #tpu.memory_space<vmem>>, vector<1x8x256xf32>,
    return
  }
  func.func @transform_0(%arg0: i32, %arg1: i32) -> (i32, i32, i32) {
    %c0_i32 = arith.constant 0 : i32
    %c0_i32_0 = arith.constant 0 : i32
    return %arg0, %c0_i32, %arg1 : i32, i32, i32
  }
  func.func @transform_1(%arg0: i32, %arg1: i32) -> (i32, i32) {
    %c0_i32 = arith.constant 0 : i32
    %c0_i32_0 = arith.constant 0 : i32
    %c0_i32_1 = arith.constant 0 : i32
    return %c0_i32, %c0_i32_0 : i32, i32
  }
  func.func @transform_2(%arg0: i32, %arg1: i32) -> (i32, i32) {
    %c0_i32 = arith.constant 0 : i32
    %c0_i32_0 = arith.constant 0 : i32
    %c0_i32_1 = arith.constant 0 : i32
    return %c0_i32, %c0_i32_0 : i32, i32
  }
  func.func @transform_3(%arg0: i32, %arg1: i32) -> i32 {
    %c0_i32 = arith.constant 0 : i32
    %c0_i32_0 = arith.constant 0 : i32
    return %c0_i32 : i32
  }
  func.func @transform_4(%arg0: i32, %arg1: i32) -> (i32, i32, i32) {
    %c0_i32 = arith.constant 0 : i32
    %c0_i32_0 = arith.constant 0 : i32
    return %arg0, %c0_i32, %arg1 : i32, i32, i32
  }
}

</mosaic_0001>

<bundles_post_ra>
// kernel: output_block_forward.1
= control target key start
LH: loop header
LB: loop body
LE: loop exit
PB: predicated region body
PF: predicated region fallthrough
CT: control target
= control target key end

     0   :  { %s504_s17 = smov 0   ;;  %s506_s18 = smov 0   ;;  %s547_s0 = inlined_call_operand.vmem [shape: f32[2,4,256], index: 0, kind: input, shape index: {}]   ;;  %s548_s1 = inlined_call_operand.vmem [shape: f32[8,4], index: 1, kind: input, shape index: {}]   ;;  %s549_s2 = inlined_call_operand.vmem [shape: f32[8,1], index: 2, kind: input, shape index: {}]   ;;  %s550_s3 = inlined_call_operand.<no memory space> [shape: f32[1], index: 3, kind: input, shape index: {}]   ;;  %s551_s4 = inlined_call_operand.vmem [shape: f32[2,8,256], index: 4, kind: output, shape index: {}]  }
   0x1   :  { %9 = sst [smem:[#allocation2]] %s550_s3  ;;  %s508_s19 = smov 0  }
   0x2 LB: > { %s27_s3 = sadd.s32 1, %s466_s18  ;;  %p405_p0 = scmp.ge.s32.totalorder %s470_s19, 1  ;;  %s470_s19 = sphi %s508_s19, %s15_s19   ;;  %s466_s18 = sphi %s506_s18, %s553_s18   ;;  %s462_s17 = sphi %s504_s17, %s552_s17  }
   0x3   : > { %p29_p1 = scmp.ge.s32.totalorder %s27_s3, 2  ;;  %p184_p2 = scmp.lt.s32.totalorder %s470_s19, 3 }
   0x5   : > { %s555_s3 = smov (%p29_p1, %s27_s3), 0  ;;  %p185_p3 = pnand %p405_p0, %p184_p2 }
   0x6   : > { %p219_p4 = scmp.lt.s32.totalorder (!%p185_p3), %s462_s17, 1  ;;  %s240_s28 = sld [smem:[#allocation2]] (!%p185_p3) }
   0x7   : > { %188 = sbr.rel (%p185_p3) target bundleno = 153 (0x99), region = 36 }
   0xc   : > { %v238_v0 = vld [vmem:[%s548_s1] sm:$0xff]  ;;  %v472_v1 = vmov 0   ;;  %v473_v2 = vmov 2   ;;  %v474_v4 = vmov 1   ;;  %v475_v5 = vmov 3   ;;  %s557_s17 = smov (!%p219_p4, %s462_s17), 1 }
   0xd   : > { %442 = vset.pattern.permute.xlu0 %v472_v1  ;;  %444 = vset.pattern.permute.xlu1 %v473_v2  ;;  %v239_v3 = vld [vmem:[%s549_s2] sm:$0xff]  ;;  %s412_s24 = sshll.u32 %s557_s17, 3  ;;  %v307_v42 = vstv %s240_s28  ;;  %s413_s29 = sshll.u32 %s557_s17, 4 }
   0xe   : > { %244 = vperm.xlu0 %442, %v238_v0   ;;  %271 = vperm.xlu1 %444, %v238_v0   ;;  %s226_s27 = scalar_lea.vmem %s547_s0, %s412_s24  ;;  %s236_s6 = scalar_lea.vmem %s551_s4, %s413_s29 }
   0xf   : > { %446 = vset.pattern.permute.xlu2 %v472_v1  ;;  %v241_v6 = vld [vmem:[%s226_s27] sm:$0xff] }
  0x10   : > { %300 = vperm.xlu2 %446, %v239_v3   ;;  %v248_v9 = vperm.slane %v241_v6, 0  ;;  %v249_v10 = vperm.slane %v241_v6, 4  ;;  %v260_v11 = vperm.slane %v241_v6, 1  ;;  %v261_v12 = vperm.slane %v241_v6, 5 }
  0x11   : > { %v274_v13 = vperm.slane %v241_v6, 2  ;;  %v275_v14 = vperm.slane %v241_v6, 6  ;;  %v288_v15 = vperm.slane %v241_v6, 3  ;;  %v289_v16 = vperm.slane %v241_v6, 7 }
  0x12   : > { %v252_v17 = vperm.slane %v248_v9, 0  ;;  %v253_v18 = vperm.slane %v249_v10, 0  ;;  %v264_v19 = vperm.slane %v260_v11, 1  ;;  %v265_v20 = vperm.slane %v261_v12, 1 }
  0x13   : > { %v278_v21 = vperm.slane %v274_v13, 2  ;;  %v279_v22 = vperm.slane %v275_v14, 2  ;;  %v292_v23 = vperm.slane %v288_v15, 3  ;;  %v293_v24 = vperm.slane %v289_v16, 3 }
  0x16   : > { %443 = vset.pattern.permute.xlu0 %v474_v4  ;;  %445 = vset.pattern.permute.xlu1 %v475_v5 }
  0x17   : > { %257 = vperm.xlu0 %443, %v238_v0   ;;  %285 = vperm.xlu1 %445, %v238_v0  }
  0x1f   : > { %447 = vset.pattern.permute.xlu0 %v472_v1 }
  0x6a   : > { %v301_v39 = vpop.permute.xlu2 %300 }
  0x80   : > { %v245_v7 = vpop.permute.xlu0 %244  ;;  %v272_v8 = vpop.permute.xlu1 %271 }
  0x81   : > { %v254_v27 = vmul.f32 %v252_v17, %v245_v7  ;;  %v255_v28 = vmul.f32 %v253_v18, %v245_v7  ;;  %v280_v31 = vmul.f32 %v278_v21, %v272_v8  ;;  %v281_v32 = vmul.f32 %v279_v22, %v272_v8 }
  0x89   : > { %v258_v25 = vpop.permute.xlu0 %257  ;;  %v286_v26 = vpop.permute.xlu1 %285 }
  0x8a   : > { %v266_v29 = vmul.f32 %v264_v19, %v258_v25  ;;  %v267_v30 = vmul.f32 %v265_v20, %v258_v25  ;;  %v294_v35 = vmul.f32 %v292_v23, %v286_v26  ;;  %v295_v36 = vmul.f32 %v293_v24, %v286_v26 }
  0x8c   : > { %v268_v33 = vadd.f32 %v266_v29, %v254_v27  ;;  %v269_v34 = vadd.f32 %v267_v30, %v255_v28 }
  0x8e   : > { %v282_v37 = vadd.f32 %v280_v31, %v268_v33  ;;  %v283_v38 = vadd.f32 %v281_v32, %v269_v34 }
  0x90   : > { %v296_v40 = vadd.f32 %v294_v35, %v282_v37  ;;  %v297_v41 = vadd.f32 %v295_v36, %v283_v38 }
  0x92   : > { %v303_v43 = vadd.f32 %v301_v39, %v296_v40  ;;  %v304_v44 = vadd.f32 %v301_v39, %v297_v41 }
  0x94   : > { %vm305_vm0 = vcmp.gt.f32.partialorder %v303_v43, 0.0  ;;  %vm306_vm1 = vcmp.gt.f32.partialorder %v304_v44, 0.0  ;;  %v308_v45 = vmul.f32 %v307_v42, %v303_v43  ;;  %v309_v46 = vmul.f32 %v307_v42, %v304_v44 }
  0x96   : > { %v310_v47 = vsel %vm305_vm0, %v303_v43, %v308_v45  ;;  %v311_v48 = vsel %vm306_vm1, %v304_v44, %v309_v46 }
  0x97   : > { %312 = vst [vmem:[%s236_s6] sm:$0xff] %v310_v47 }
  0x98   : > { %313 = vst [vmem:[%s236_s6 + $0x8] sm:$0xff] %v311_v48 }
  0x99 PF: > { %s15_s19 = sadd.s32 1, %s470_s19   ;;  %s552_s17 = smov %s466_s18 }
  0x9a   : > { %p12_p5 = scmp.ge.s32.totalorder %s15_s19, 4   ;;  %s553_s18 = smov %s555_s3 }
  0x9c   :  { %14 = sbr.rel (!%p12_p5) target bundleno = 2 (0x2), region = 66 }

</bundles_post_ra>
